<compile_context>
chip_gen: v7x
topology: tpu7x:2x2x1
jax: 0.10.0
libtpu: 0.0.40
codegen_flags: <defaults>
</compile_context>

<pallas_src>
import functools

import jax
import jax.numpy as jnp
from jax.experimental import pallas as pl
from jax.experimental.pallas import tpu as pltpu

BITS = 8        # quantizer bit width (module __init__ arg)
DECIMALS = 0    # torch.round decimals (module __init__ arg)

_LANE_COLS = 1024                      # lane-dense slab width (multiple of 128)
_TARGET_BLOCK_BYTES = 4 * 1024 * 1024  # ~4 MiB per block


def _round_up(v, m):
    return ((v + m - 1) // m) * m


def _pick_block_rows(rows, itemsize):
    """Dtype-aware block sizing.

    * sublane granularity: 8 rows for 4-byte, 16 for 2-byte dtypes
    * target ~4 MiB per block (amortizes ~0.35us/step grid overhead)
    * for non-tiny inputs, cap at ceil(rows/2) so the grid has >= 2 steps and
      the "parallel" axis can shard across v7x's two TensorCores.
    """
    sub = max(8, 32 // itemsize)
    max_rows = max(sub, _round_up(_TARGET_BLOCK_BYTES // (_LANE_COLS * itemsize), sub))
    if rows <= 8 * sub:
        # Tiny tensor: one block covering everything (block == full dim is
        # always a legal block shape); splitting would only add step overhead.
        return rows
    half = _round_up(-(-rows // 2), sub)   # ceil(rows/2), sublane-aligned
    return min(max_rows, half)


def quant_round_kernel(x_ref, o_ref, *, scale, decimals, qmin, qmax):
    """round(x, decimals) followed by signed per-tensor fake-quant.

    NOTE: the final grid step may read out-of-bounds (undefined) rows of the
    input; that is safe here because the math is pure elementwise arithmetic
    and the corresponding output rows are masked on writeback. Do not add ops
    that could propagate those rows (e.g. cross-row reductions).
    """
    x = x_ref[...].astype(jnp.float32)

    # torch.round(x, decimals=d) == round(x * 10^d) / 10^d (half-to-even).
    if decimals != 0:
        pow10 = jnp.float32(10.0 ** decimals)
        y = jnp.round(x * pow10) / pow10
    else:
        y = jnp.round(x)

    # Divide (not multiply-by-reciprocal) to match the brevitas reference at
    # rounding-tie boundaries; EUP/VALU have huge slack since the op is
    # HBM-bound, so the divide is free.
    q = jnp.round(y / jnp.float32(scale))
    q = jnp.clip(q, qmin, qmax)            # signed range [-2^(b-1), 2^(b-1)-1]
    o_ref[...] = (q * jnp.float32(scale)).astype(o_ref.dtype)


def _quant_round_jax(x, scale, decimals, qmin, qmax):
    """Plain-JAX path (ragged <1024-element tail, and reference for testing)."""
    x = x.astype(jnp.float32)
    if decimals != 0:
        pow10 = jnp.float32(10.0 ** decimals)
        y = jnp.round(x * pow10) / pow10
    else:
        y = jnp.round(x)
    q = jnp.clip(jnp.round(y / jnp.float32(scale)), qmin, qmax)
    return q * jnp.float32(scale)


def quant_round(x, scale, *, bits=BITS, decimals=DECIMALS):
    """x: any-shape float array (NCHW in the module). scale: static Python float.

    TODO(synk): brevitas' ParamFromRuntimePercentileScaling learns `scale` from
    runtime percentile statistics (collect_stats_steps=8192); here it is a
    fixed per-tensor parameter baked into the kernel (switch to an SMEM scalar
    operand if scale ever becomes a traced/learned array).
    """
    orig_shape = x.shape
    orig_dtype = x.dtype
    total = x.size
    qmax = float(2 ** (bits - 1) - 1)      # narrow_range=False
    qmin = float(-(2 ** (bits - 1)))
    scale = float(scale)

    flat = x.reshape(-1)
    bulk = (total // _LANE_COLS) * _LANE_COLS   # lane-aligned bulk -> kernel

    pieces = []
    if bulk > 0:
        rows = bulk // _LANE_COLS
        x2 = flat[:bulk].reshape(rows, _LANE_COLS)   # no pad; copy-free when bulk==total
        itemsize = x.dtype.itemsize
        block_rows = _pick_block_rows(rows, itemsize)

        kernel = functools.partial(
            quant_round_kernel, scale=scale, decimals=decimals, qmin=qmin, qmax=qmax)

        out2 = pl.pallas_call(
            kernel,
            out_shape=jax.ShapeDtypeStruct((rows, _LANE_COLS), orig_dtype),
            grid=(pl.cdiv(rows, block_rows),),       # ragged final block, masked writeback
            in_specs=[pl.BlockSpec((block_rows, _LANE_COLS), lambda i: (i, 0))],
            out_specs=pl.BlockSpec((block_rows, _LANE_COLS), lambda i: (i, 0)),
            compiler_params=pltpu.CompilerParams(
                dimension_semantics=("parallel",),   # shards grid across v7x's 2 TCs
                vmem_limit_bytes=32 * 1024 * 1024,
            ),
            cost_estimate=pl.CostEstimate(
                flops=7 * bulk,
                transcendentals=0,
                bytes_accessed=2 * bulk * itemsize,
            ),
        )(x2)

        if bulk == total:
            return out2.reshape(orig_shape)
        pieces.append(out2.reshape(-1))

    if total > bulk:
        # <=1023-element ragged tail: plain JAX is cheaper than padding the whole
        # tensor (which would add full-tensor HBM copies on both sides).
        tail = _quant_round_jax(flat[bulk:], scale, decimals, qmin, qmax)
        pieces.append(tail.astype(orig_dtype))

    return jnp.concatenate(pieces).reshape(orig_shape)


if __name__ == "__main__":
    key = jax.random.PRNGKey(0)

    # Deterministic stand-in for the learned (percentile-derived) per-tensor scale.
    # Power-of-two scale -> exact f32 arithmetic in both kernel and reference.
    scale = 0.03125

    # Main test: NCHW activation whose size is an exact multiple of 1024
    # (fully copy-free path through the kernel).
    x = jax.random.normal(key, (2, 4, 16, 16), dtype=jnp.float32)
    out = jax.block_until_ready(quant_round(x, scale))
    ref = _quant_round_jax(x, scale, DECIMALS, -128.0, 127.0).astype(x.dtype)
    assert out.shape == x.shape and out.dtype == x.dtype
    assert jnp.max(jnp.abs(out - ref)) < 1e-6

    # Ragged test: size not a multiple of 1024 (bulk -> kernel, tail -> plain JAX).
    x2 = jax.random.normal(jax.random.PRNGKey(1), (1, 3, 22, 22), dtype=jnp.float32)
    out2 = jax.block_until_ready(quant_round(x2, scale))
    ref2 = _quant_round_jax(x2, scale, DECIMALS, -128.0, 127.0).astype(x2.dtype)
    assert out2.shape == x2.shape and out2.dtype == x2.dtype
    assert jnp.max(jnp.abs(out2 - ref2)) < 1e-6

    print("KERNEL_OK")
</pallas_src>

<mosaic_0001>
module attributes {stable_mosaic.version = 11 : i64} {
  func.func @quant_round_kernel(%arg0: i32, %arg1: memref<2x1024xf32, #tpu.memory_space<vmem>>, %arg2: memref<2x1024xf32, #tpu.memory_space<vmem>>) attributes {dimension_semantics = [#tpu.dimension_semantics<parallel>], iteration_bounds = array<i64: 1>, scalar_prefetch = 0 : i64, scratch_operands = 0 : i64, tpu.core_type = #tpu.core_type<tc>, window_params = [{transform_indices = @transform_0, window_bounds = array<i64: 2, 1024>}, {transform_indices = @transform_1, window_bounds = array<i64: 2, 1024>}]} {
    %c0 = arith.constant 0 : index
    %c0_0 = arith.constant 0 : index
    %0 = vector.load %arg1[%c0, %c0_0] : memref<2x1024xf32, #tpu.memory_space<vmem>>, vector<2x1024xf32>
    %1 = math.roundeven %0 : vector<2x1024xf32>
    %cst = arith.constant 3.125000e-02 : f32
    %2 = vector.broadcast %cst : f32 to vector<2x1024xf32>
    %3 = arith.divf %1, %2 : vector<2x1024xf32>
    %4 = math.roundeven %3 : vector<2x1024xf32>
    %cst_1 = arith.constant -1.280000e+02 : f32
    %cst_2 = arith.constant 1.270000e+02 : f32
    %5 = vector.broadcast %cst_1 : f32 to vector<2x1024xf32>
    %6 = arith.maximumf %5, %4 : vector<2x1024xf32>
    %7 = vector.broadcast %cst_2 : f32 to vector<2x1024xf32>
    %8 = arith.minimumf %7, %6 : vector<2x1024xf32>
    %cst_3 = arith.constant 3.125000e-02 : f32
    %9 = vector.broadcast %cst_3 : f32 to vector<2x1024xf32>
    %10 = arith.mulf %8, %9 : vector<2x1024xf32>
    %c0_4 = arith.constant 0 : index
    %c0_5 = arith.constant 0 : index
    %11 = vector.load %arg2[%c0_4, %c0_5] : memref<2x1024xf32, #tpu.memory_space<vmem>>, vector<2x1024xf32>
    tpu.vector_store %arg2[%c0_4, %c0_5], %10 {strides = array<i32>} : memref<2x1024xf32, #tpu.memory_space<vmem>>, vector<2x1024xf32>,
    return
  }
  func.func @transform_0(%arg0: i32) -> (i32, i32) {
    %c0_i32 = arith.constant 0 : i32
    %c0_i32_0 = arith.constant 0 : i32
    return %arg0, %c0_i32 : i32, i32
  }
  func.func @transform_1(%arg0: i32) -> (i32, i32) {
    %c0_i32 = arith.constant 0 : i32
    %c0_i32_0 = arith.constant 0 : i32
    return %arg0, %c0_i32 : i32, i32
  }
}

</mosaic_0001>

<bundles_post_ra>
// kernel: tpu_custom_call.1
= control target key start
LH: loop header
LB: loop body
LE: loop exit
PB: predicated region body
PF: predicated region fallthrough
CT: control target
= control target key end

     0   :  { %6 = vsyncpa [#allocation3], 0  ;;  %s143_s0 = inlined_call_operand.hbm [shape: f32[2,1024], index: 0, kind: input, shape index: {}]   ;;  %s144_s1 = inlined_call_operand.hbm [shape: f32[2,1024], index: 1, kind: output, shape index: {}]  }
   0x1   :  { %7 = vsyncpa [#allocation4], 0  ;;  %s107_s6 = smov [#allocation2]   ;;  %s59_s10 = scalar_lea.hbm %s143_s0, 256 }
   0x2   :  { %s14_s7 = sshll.u32 %s107_s6, 4  ;;  %p60_p0 = scmp.ne.s32.totalorder %s143_s0, %s59_s10  ;;  %s15_s7 = int_to_ptr.vmem [resolvable:$true] %s14_s7 }
   0x3   :  { %p63_p1 = scmp.lt.u32.totalorder %s59_s10, %s143_s0 }
   0x5   :  { %p65_p2 = pnand %p63_p1, %p60_p0 }
   0x7   :  { %68 = shalt.err (!%p65_p2)
}
   0x8   :  { %s69_s15 = scalar_lea.vmem %s15_s7, 256  ;;  %p74_p4 = scmp.lt.s32.totalorder %s15_s7, %s15_s7 }
   0x9   :  { %p70_p3 = scmp.ne.s32.totalorder %s15_s7, %s69_s15  ;;  %p75_p5 = scmp.lt.s32.totalorder %s69_s15, %s69_s15 }
   0xb   :  { %p76_p6 = por %p75_p5, %p74_p4 }
   0xd   :  { %p77_p7 = pnand %p76_p6, %p70_p3 }
   0xf   :  { %80 = shalt.err (!%p77_p7)
}
  0x10   :  { %17 = dma.hbm_to_vmem [thread:$0]  %s143_s0, 256, %s15_s7, [#allocation3]  }
  0x11   :  { %103 = dma.done.wait [#allocation3], 256  }
  0x12   :  { %104 = vsyncadd [#allocation3], 4294967040  ;;  %v21_v0 = vld [vmem:[#allocation2] sm:$0xff]  ;;  %v22_v1 = vld [vmem:[#allocation2 + $0x8] sm:$0xff]  ;;  %s108_s18 = smov [#allocation5]  }
  0x13   :  { %v53_v2 = vround.rtne.f32 %v21_v0  ;;  %v54_v3 = vround.rtne.f32 %v22_v1  ;;  %s44_s19 = sshll.u32 %s108_s18, 4  ;;  %s45_s19 = int_to_ptr.vmem [resolvable:$true] %s44_s19 }
  0x14   :  { %s81_s0 = scalar_lea.vmem %s45_s19, 256  ;;  %p86_p9 = scmp.lt.s32.totalorder %s45_s19, %s45_s19 }
  0x15   :  { %v26_v4 = vmul.f32 32.0, %v53_v2  ;;  %v27_v5 = vmul.f32 32.0, %v54_v3  ;;  %p82_p8 = scmp.ne.s32.totalorder %s45_s19, %s81_s0  ;;  %p87_p10 = scmp.lt.s32.totalorder %s81_s0, %s81_s0 }
  0x17   :  { %v55_v6 = vround.rtne.f32 %v26_v4  ;;  %v56_v7 = vround.rtne.f32 %v27_v5  ;;  %p88_p11 = por %p87_p10, %p86_p9 }
  0x19   :  { %v30_v8 = vmax.f32 %v55_v6, -128.0  ;;  %v31_v9 = vmax.f32 %v56_v7, -128.0  ;;  %p89_p12 = pnand %p88_p11, %p82_p8 }
  0x1b   :  { %v32_v10 = vmin.f32 %v30_v8, 127.0  ;;  %v33_v11 = vmin.f32 %v31_v9, 127.0 }
  0x1d   :  { %v34_v12 = vmul.f32 0.03125, %v32_v10  ;;  %v35_v13 = vmul.f32 0.03125, %v33_v11 }
  0x1f   :  { %36 = vst [vmem:[#allocation5] sm:$0xff] %v34_v12  ;;  %37 = vst [vmem:[#allocation5 + $0x8] sm:$0xff] %v35_v13 }
  0x20   :  { %92 = shalt.err (!%p89_p12)
}
  0x21   :  { %s93_s22 = scalar_lea.hbm %s144_s1, 256 }
  0x22   :  { %p94_p13 = scmp.ne.s32.totalorder %s144_s1, %s93_s22  ;;  %p97_p0 = scmp.lt.u32.totalorder %s93_s22, %s144_s1 }
  0x24   :  { %p99_p1 = pnand %p97_p0, %p94_p13 }
  0x26   :  { %102 = shalt.err (!%p99_p1)
}
  0x27   :  { %47 = dma.vmem_to_hbm [thread:$0]  %s45_s19, 256, %s144_s1, [#allocation4]  }
  0x28   :  { %105 = dma.done.wait [#allocation4], 256  }
  0x29   :  { %106 = vsyncadd [#allocation4], 4294967040 }
  0x2a   :  { %51 = vsyncpa [#allocation3], 1 }
  0x2b   :  { %52 = vsyncpa [#allocation4], 1 }

</bundles_post_ra>
